<compile_context>
chip_gen: v7x
topology: tpu7x:2x2x1
jax: 0.10.0
libtpu: 0.0.40
codegen_flags: <defaults>
</compile_context>

<pallas_src>
from typing import NamedTuple

import jax
import jax.numpy as jnp
from jax.experimental import pallas as pl
from jax.experimental.pallas import tpu as pltpu


_VPU_PROJ_MAX_C = 8   # use the VPU/XLU projection path for n_classes <= this


def _round_up(v, m):
    return ((v + m - 1) // m) * m


def _vmem_capacity_bytes(default=64 << 20):
    """Per-core VMEM capacity; conservative fallback (v7x per-TC) if unknown."""
    try:
        info = pltpu.get_tpu_info()
        cap = getattr(info, "vmem_capacity_bytes", None)
        if cap:
            return int(cap)
    except Exception:
        pass
    return default


class GatedAttnParams(NamedTuple):
    w_ab: jax.Array   # (L, 2*D_pad)   fused [Wa^T | Wb^T], matmul dtype (bf16 default)
    b_ab: jax.Array   # (1, 2*D_pad)   fused [ba | bb], f32
    w_c: jax.Array    # (C, D_pad) f32 if C <= 8 (VPU path) else (D_pad, C) matmul dtype
    b_c: jax.Array    # (1, C), f32
    L: int
    D_pad: int
    C: int


def prepare_params(wa, ba, wb, bb, wc, bc, *, matmul_dtype=jnp.bfloat16):
    """One-time parameter prep (call at model load, not per forward).

    wa, wb : [D, L]   ba, bb : [D]     (PyTorch Linear layout)
    wc     : [C, D]   bc     : [C]

    matmul_dtype=jnp.bfloat16 (default) keeps f32 accumulation on the MXU but
    halves weight VMEM and avoids multi-pass f32 MXU emulation.  Pass
    jnp.float32 for strict PyTorch-f32 parity.
    """
    D, L = wa.shape
    C = wc.shape[0]
    D_pad = _round_up(D, 128)

    def pad_cols(w, cols):
        return jnp.pad(w, ((0, 0), (0, cols - w.shape[1])))

    wa_t = pad_cols(wa.T.astype(jnp.float32), D_pad)           # (L, D_pad)
    wb_t = pad_cols(wb.T.astype(jnp.float32), D_pad)           # (L, D_pad)
    w_ab = jnp.concatenate([wa_t, wb_t], axis=1).astype(matmul_dtype)

    b_ab = jnp.concatenate([
        jnp.pad(ba.astype(jnp.float32), (0, D_pad - D)),
        jnp.pad(bb.astype(jnp.float32), (0, D_pad - D)),
    ]).reshape(1, 2 * D_pad)

    if C <= _VPU_PROJ_MAX_C:
        # Row-vectors for the VPU-multiply + lane-reduce projection path.
        w_c = pad_cols(wc.astype(jnp.float32), D_pad)          # (C, D_pad) f32
    else:
        w_c = jnp.pad(wc.T.astype(jnp.float32),
                      ((0, D_pad - D), (0, 0))).astype(matmul_dtype)  # (D_pad, C)
    b_c = bc.astype(jnp.float32).reshape(1, C)

    return GatedAttnParams(w_ab, b_ab, w_c, b_c, L, D_pad, C)


def _make_kernel(d_pad, n_classes, vpu_proj, mm_dtype, precision, ew_dtype):
    def kernel(x_ref, wab_ref, bab_ref, wc_ref, bc_ref, out_ref):
        # Cast the streamed x tile to the matmul dtype in VMEM (pipelined VPU
        # op) instead of a separate wrapper-side XLA pass over HBM.
        x = x_ref[...].astype(mm_dtype)                        # (tn, L)
        # Fused gate projection: one MXU pass over (tn, L) x (L, 2*D_pad),
        # f32 accumulation.
        g = jnp.dot(x, wab_ref[...],
                    preferred_element_type=jnp.float32,
                    precision=precision)                       # (tn, 2*D_pad) f32
        g = (g + bab_ref[...]).astype(ew_dtype)
        a = jnp.tanh(g[:, :d_pad])                             # EUP
        b = jax.nn.sigmoid(g[:, d_pad:])                       # EUP
        h = a * b                                              # VPU
        if vpu_proj:
            # Small n_classes: VPU multiply + XLU lane reduce per class.
            # Avoids a tiny-column MXU matmul (and the MXU RHS swap) right
            # after the big gate matmul.
            cols = []
            for c in range(n_classes):
                wrow = wc_ref[c:c + 1, :].astype(ew_dtype)     # (1, D_pad)
                cols.append(jnp.sum(h * wrow, axis=-1, keepdims=True))
            proj = cols[0] if n_classes == 1 else jnp.concatenate(cols, axis=-1)
            out = proj.astype(jnp.float32) + bc_ref[...]
        else:
            out = jnp.dot(h.astype(mm_dtype), wc_ref[...],
                          preferred_element_type=jnp.float32,
                          precision=precision) + bc_ref[...]
        out_ref[...] = out.astype(out_ref.dtype)
    return kernel


def attn_net_gated(x, params: GatedAttnParams, *, tile_n=None, out_dtype=None,
                   elementwise_dtype=jnp.float32):
    """Pallas forward of Attn_Net_Gated. Returns (A [N, C], x [N, L]).

    elementwise_dtype: keep f32 on v5e (no bf16 VPU/EUP); jnp.bfloat16 is a
    good choice on v6e/v7x once the matmul is bf16.
    """
    N, L = x.shape
    assert L == params.L, "x feature dim does not match prepared params"
    w_ab, b_ab, w_c, b_c, _, D_pad, C = params
    if out_dtype is None:
        out_dtype = x.dtype

    mm_dtype = w_ab.dtype
    vpu_proj = C <= _VPU_PROJ_MAX_C

    xb = jnp.dtype(x.dtype).itemsize
    mmb = jnp.dtype(mm_dtype).itemsize
    ob = jnp.dtype(out_dtype).itemsize
    ewb = jnp.dtype(elementwise_dtype).itemsize

    w_bytes = (w_ab.size * mmb + b_ab.size * 4
               + w_c.size * jnp.dtype(w_c.dtype).itemsize + b_c.size * 4)

    vmem_cap = _vmem_capacity_bytes()

    # --- Generation-aware row-tile sizing ------------------------------------
    if tile_n is None:
        per_row = (2 * L * xb             # x tile, double-buffered, HBM dtype
                   + L * mmb              # in-kernel cast copy of the x tile
                   + 4 * D_pad * 4        # g (f32) + producer headroom
                   + 4 * D_pad * ewb      # a, b, h, h*wc intermediates
                   + 2 * C * ob)          # output tile, double-buffered
        budget = int(vmem_cap * 0.7) - 2 * w_bytes
        budget_tile = max(256, budget // max(per_row, 1))
        # Guarantee >= ~4 grid steps so v7x's two TensorCores both get rows.
        steps_target = _round_up(pl.cdiv(max(N, 1), 4), 256)
        tile_n = min(budget_tile, steps_target, 8192)
        tile_n = max(256, (tile_n // 256) * 256)
    tile_n = max(8, _round_up(min(int(tile_n), _round_up(N, 8)), 8))

    grid = (pl.cdiv(N, tile_n),)

    precision = (jax.lax.Precision.HIGHEST if mm_dtype == jnp.float32
                 else jax.lax.Precision.DEFAULT)
    kernel = _make_kernel(D_pad, C, vpu_proj, mm_dtype, precision,
                          elementwise_dtype)

    cost = pl.CostEstimate(
        flops=int(4 * N * L * D_pad            # fused gate matmul (2*D cols)
                  + 2 * N * D_pad * C          # class projection
                  + 3 * N * D_pad),            # gating elementwise
        transcendentals=int(2 * N * D_pad),    # tanh + sigmoid
        bytes_accessed=int(N * L * xb + w_bytes + N * C * ob))

    vmem_est = (2 * tile_n * L * xb            # x double buffer
                + tile_n * L * mmb             # in-kernel bf16 copy of x tile
                + 4 * tile_n * D_pad * 4       # f32 g + headroom
                + 4 * tile_n * D_pad * ewb     # a, b, h, ...
                + 2 * w_bytes                  # weights (counted 2x, safe)
                + 2 * tile_n * C * ob)         # output double buffer
    vmem_limit = int(min(vmem_cap, max(32 << 20, vmem_est + (8 << 20))))

    A = pl.pallas_call(
        kernel,
        out_shape=jax.ShapeDtypeStruct((N, C), out_dtype),
        grid_spec=pltpu.PrefetchScalarGridSpec(
            num_scalar_prefetch=0,
            grid=grid,
            in_specs=[
                pl.BlockSpec((tile_n, L), lambda i: (i, 0)),    # x rows (ragged tail OK)
                pl.BlockSpec(w_ab.shape, lambda i: (0, 0)),     # [Wa^T | Wb^T]
                pl.BlockSpec(b_ab.shape, lambda i: (0, 0)),     # [ba | bb]
                pl.BlockSpec(w_c.shape, lambda i: (0, 0)),      # Wc
                pl.BlockSpec(b_c.shape, lambda i: (0, 0)),      # bc
            ],
            out_specs=pl.BlockSpec((tile_n, C), lambda i: (i, 0)),
        ),
        compiler_params=pltpu.CompilerParams(
            dimension_semantics=("parallel",),   # rows shard across TCs (v7x)
            vmem_limit_bytes=vmem_limit),
        cost_estimate=cost,
    )(x, w_ab, b_ab, w_c, b_c)

    return A, x


def _init_linear(key, out_features, in_features, dtype=jnp.float32):
    """Deterministic PyTorch-style (uniform) init for a Linear layer."""
    kw, kb = jax.random.split(key)
    bound = 1.0 / (in_features ** 0.5)
    w = jax.random.uniform(kw, (out_features, in_features), dtype,
                           minval=-bound, maxval=bound)
    b = jax.random.uniform(kb, (out_features,), dtype,
                           minval=-bound, maxval=bound)
    return w, b


if __name__ == "__main__":
    # Deliberately small, unaligned shapes to exercise padding / ragged paths.
    N, L, D = 100, 48, 24
    key = jax.random.PRNGKey(0)
    kx, ka, kb, kc = jax.random.split(key, 4)

    x = jax.random.normal(kx, (N, L), jnp.float32)
    wa, ba = _init_linear(ka, D, L)      # attention_a Linear(L, D)
    wb, bb = _init_linear(kb, D, L)      # attention_b Linear(L, D)

    def reference(wc, bc):
        hp = jax.lax.Precision.HIGHEST
        a = jnp.tanh(jnp.dot(x, wa.T, precision=hp) + ba)
        b = jax.nn.sigmoid(jnp.dot(x, wb.T, precision=hp) + bb)
        return jnp.dot(a * b, wc.T, precision=hp) + bc

    # --- C == 1 (CLAM default), bf16 gate matmul (new default), auto tile.
    wc1, bc1 = _init_linear(kc, 1, D)    # attention_c Linear(D, 1)
    p1 = prepare_params(wa, ba, wb, bb, wc1, bc1)
    A1, x_out = attn_net_gated(x, p1)
    jax.block_until_ready((A1, x_out))
    assert A1.shape == (N, 1) and x_out.shape == (N, L)
    assert jnp.allclose(A1, reference(wc1, bc1), atol=3e-2, rtol=3e-2)
    assert jnp.array_equal(x_out, x)

    # --- Strict f32 parity mode, multi-step grid with a ragged tail block.
    p1_f32 = prepare_params(wa, ba, wb, bb, wc1, bc1, matmul_dtype=jnp.float32)
    A1f, _ = attn_net_gated(x, p1_f32, tile_n=64)    # grid=(2,), tail = 36 rows
    jax.block_until_ready(A1f)
    assert jnp.allclose(A1f, reference(wc1, bc1), atol=5e-5, rtol=5e-5)

    # --- Small C > 1: VPU/XLU projection path (C <= 8), bf16 default.
    wc3, bc3 = _init_linear(kc, 3, D)
    p3 = prepare_params(wa, ba, wb, bb, wc3, bc3)
    A3, _ = attn_net_gated(x, p3)
    jax.block_until_ready(A3)
    assert A3.shape == (N, 3)
    assert jnp.allclose(A3, reference(wc3, bc3), atol=3e-2, rtol=3e-2)

    # --- Larger C: MXU projection path, bf16 default.
    wc12, bc12 = _init_linear(kc, 12, D)
    p12 = prepare_params(wa, ba, wb, bb, wc12, bc12)
    A12, _ = attn_net_gated(x, p12)
    jax.block_until_ready(A12)
    assert A12.shape == (N, 12)
    assert jnp.allclose(A12, reference(wc12, bc12), atol=3e-2, rtol=3e-2)

    print("KERNEL_OK")
</pallas_src>

<mosaic_0001>
module attributes {stable_mosaic.version = 11 : i64} {
  func.func @kernel(%arg0: i32, %arg1: memref<104x48xf32, #tpu.memory_space<vmem>>, %arg2: memref<48x256xbf16, #tpu.memory_space<vmem>>, %arg3: memref<1x256xf32, #tpu.memory_space<vmem>>, %arg4: memref<1x128xf32, #tpu.memory_space<vmem>>, %arg5: memref<1x1xf32, #tpu.memory_space<vmem>>, %arg6: memref<104x1xf32, #tpu.memory_space<vmem>>) attributes {dimension_semantics = [#tpu.dimension_semantics<parallel>], iteration_bounds = array<i64: 1>, scalar_prefetch = 0 : i64, scratch_operands = 0 : i64, tpu.core_type = #tpu.core_type<tc>, window_params = [{transform_indices = @transform_0, window_bounds = array<i64: 104, 48>}, {pipeline_mode = #tpu.pipeline_mode<synchronous>, transform_indices = @transform_1, window_bounds = array<i64: 48, 256>}, {pipeline_mode = #tpu.pipeline_mode<synchronous>, transform_indices = @transform_2, window_bounds = array<i64: 1, 256>}, {pipeline_mode = #tpu.pipeline_mode<synchronous>, transform_indices = @transform_3, window_bounds = array<i64: 1, 128>}, {pipeline_mode = #tpu.pipeline_mode<synchronous>, transform_indices = @transform_4, window_bounds = array<i64: 1, 1>}, {transform_indices = @transform_5, window_bounds = array<i64: 104, 1>}]} {
    %c0 = arith.constant 0 : index
    %c0_0 = arith.constant 0 : index
    %0 = vector.load %arg1[%c0, %c0_0] : memref<104x48xf32, #tpu.memory_space<vmem>>, vector<104x48xf32>
    %1 = arith.truncf %0 : vector<104x48xf32> to vector<104x48xbf16>
    %c0_1 = arith.constant 0 : index
    %c0_2 = arith.constant 0 : index
    %2 = vector.load %arg2[%c0_1, %c0_2] : memref<48x256xbf16, #tpu.memory_space<vmem>>, vector<48x256xbf16>
    %cst = arith.constant dense<0.000000e+00> : vector<104x256xf32>
    %3 = tpu.matmul %1, %2, %cst {dimension_numbers = #tpu.dot_dimension_numbers<[1], [0], [0], [1], [0, 0, 1, 1], [], []>} : vector<104x48xbf16>, vector<48x256xbf16>, vector<104x256xf32> -> vector<104x256xf32>
    %c0_3 = arith.constant 0 : index
    %c0_4 = arith.constant 0 : index
    %4 = vector.load %arg3[%c0_3, %c0_4] : memref<1x256xf32, #tpu.memory_space<vmem>>, vector<1x256xf32>
    %5 = vector.broadcast %4 : vector<1x256xf32> to vector<104x256xf32>
    %6 = arith.addf %3, %5 : vector<104x256xf32>
    %7 = vector.extract_strided_slice %6 {offsets = [0, 0], sizes = [104, 128], strides = [1, 1]} : vector<104x256xf32> to vector<104x128xf32>
    %8 = math.tanh %7 : vector<104x128xf32>
    %9 = vector.extract_strided_slice %6 {offsets = [0, 128], sizes = [104, 128], strides = [1, 1]} : vector<104x256xf32> to vector<104x128xf32>
    %10 = arith.negf %9 : vector<104x128xf32>
    %11 = math.exp %10 : vector<104x128xf32>
    %cst_5 = arith.constant 1.000000e+00 : f32
    %12 = vector.broadcast %cst_5 : f32 to vector<104x128xf32>
    %13 = arith.addf %12, %11 : vector<104x128xf32>
    %14 = arith.divf %12, %13 : vector<104x128xf32>
    %15 = arith.mulf %8, %14 : vector<104x128xf32>
    %c0_6 = arith.constant 0 : index
    %c0_7 = arith.constant 0 : index
    %16 = vector.load %arg4[%c0_6, %c0_7] : memref<1x128xf32, #tpu.memory_space<vmem>>, vector<1x128xf32>
    %17 = vector.broadcast %16 : vector<1x128xf32> to vector<104x128xf32>
    %18 = arith.mulf %15, %17 : vector<104x128xf32>
    %cst_8 = arith.constant dense<0.000000e+00> : vector<104xf32>
    %19 = vector.multi_reduction <add>, %18, %cst_8 [1] : vector<104x128xf32> to vector<104xf32>
    %20 = vector.shape_cast %19 : vector<104xf32> to vector<104x1xf32>
    %c0_9 = arith.constant 0 : index
    %c0_10 = arith.constant 0 : index
    %21 = vector.load %arg5[%c0_9, %c0_10] : memref<1x1xf32, #tpu.memory_space<vmem>>, vector<1x1xf32>
    %22 = vector.broadcast %21 : vector<1x1xf32> to vector<104x1xf32>
    %23 = arith.addf %20, %22 : vector<104x1xf32>
    %c0_11 = arith.constant 0 : index
    %c0_12 = arith.constant 0 : index
    %24 = vector.load %arg6[%c0_11, %c0_12] : memref<104x1xf32, #tpu.memory_space<vmem>>, vector<104x1xf32>
    tpu.vector_store %arg6[%c0_11, %c0_12], %23 {strides = array<i32>} : memref<104x1xf32, #tpu.memory_space<vmem>>, vector<104x1xf32>,
    return
  }
  func.func @transform_0(%arg0: i32) -> (i32, i32) {
    %c0_i32 = arith.constant 0 : i32
    %c0_i32_0 = arith.constant 0 : i32
    return %arg0, %c0_i32 : i32, i32
  }
  func.func @transform_1(%arg0: i32) -> (i32, i32) {
    %c0_i32 = arith.constant 0 : i32
    %c0_i32_0 = arith.constant 0 : i32
    %c0_i32_1 = arith.constant 0 : i32
    return %c0_i32, %c0_i32_0 : i32, i32
  }
  func.func @transform_2(%arg0: i32) -> (i32, i32) {
    %c0_i32 = arith.constant 0 : i32
    %c0_i32_0 = arith.constant 0 : i32
    %c0_i32_1 = arith.constant 0 : i32
    return %c0_i32, %c0_i32_0 : i32, i32
  }
  func.func @transform_3(%arg0: i32) -> (i32, i32) {
    %c0_i32 = arith.constant 0 : i32
    %c0_i32_0 = arith.constant 0 : i32
    %c0_i32_1 = arith.constant 0 : i32
    return %c0_i32, %c0_i32_0 : i32, i32
  }
  func.func @transform_4(%arg0: i32) -> (i32, i32) {
    %c0_i32 = arith.constant 0 : i32
    %c0_i32_0 = arith.constant 0 : i32
    %c0_i32_1 = arith.constant 0 : i32
    return %c0_i32, %c0_i32_0 : i32, i32
  }
  func.func @transform_5(%arg0: i32) -> (i32, i32) {
    %c0_i32 = arith.constant 0 : i32
    %c0_i32_0 = arith.constant 0 : i32
    return %arg0, %c0_i32 : i32, i32
  }
}

</mosaic_0001>

<bundles_post_ra>
// kernel: tpu_custom_call.1
= control target key start
LH: loop header
LB: loop body
LE: loop exit
PB: predicated region body
PF: predicated region fallthrough
CT: control target
= control target key end

     0   :  { %v524_v1 = vmov 0   ;;  %vm91_vm0 = vcmask 392192   ;;  %v51_v28 = vlaneseq  ;;  %vm384_vm1 = vcmask 7168   ;;  %s743_s1 = inlined_call_operand.vmem [shape: bf16[48,256], index: 1, kind: input, shape index: {}]   ;;  %s744_s0 = inlined_call_operand.vmem [shape: f32[100,48], index: 0, kind: input, shape index: {}]   ;;  %s745_s4 = inlined_call_operand.<no memory space> [shape: f32[1,1], index: 4, kind: input, shape index: {}]   ;;  %s746_s2 = inlined_call_operand.vmem [shape: f32[1,256], index: 2, kind: input, shape index: {}]   ;;  %s747_s3 = inlined_call_operand.vmem [shape: f32[1,128], index: 3, kind: input, shape index: {}]   ;;  %s748_s5 = inlined_call_operand.vmem [shape: f32[100,1], index: 5, kind: output, shape index: {}]  }
   0x1   :  { %v437_v0 = vld [vmem:[%s743_s1 + $0x4] ss:$8 sps:$4 sm:$0xff]   ;;  %145 = vmatprep.mubr.bf16.mxu0 %v524_v1  ;;  %185 = vmatprep.mubr.bf16.mxu1 %v524_v1  ;;  %v439_v2 = vld [vmem:[%s743_s1] ss:$8 sps:$4 sm:$0xff]   ;;  %v440_v3 = vld [vmem:[%s743_s1 + $0x14] ss:$8 sps:$4 sm:$0xff]   ;;  %v10_v27 = vstv %s745_s4 }
   0x2   :  { %113 = vmatprep.subr.bf16.mxu0 %v437_v0  ;;  %430 = vmatprep.subr.bf16.mxu1 %v437_v0  ;;  %v442_v4 = vld [vmem:[%s743_s1 + $0x10] ss:$8 sps:$4 sm:$0xff]   ;;  %v443_v5 = vld [vmem:[%s743_s1 + $0x24] ss:$8 sps:$4 sm:$0xff]   ;;  %v445_v6 = vld [vmem:[%s743_s1 + $0x20] ss:$8 sps:$4 sm:$0xff]  }
   0x3   :  { %114 = vmatpush1.bf16.msra.mxu0 %v439_v2  ;;  %433 = vmatpush1.bf16.msra.mxu1 %v439_v2  ;;  %v23_v7 = vld [vmem:[%s744_s0] sm:$0xff]  ;;  %v24_v8 = vld [vmem:[%s744_s0 + $0x8] sm:$0xff]  ;;  %v25_v13 = vld [vmem:[%s744_s0 + $0x10] sm:$0xff]  ;;  %11 = vst [vmem:[#allocation2] sm:$0x1] %v10_v27  ;;  %v52_v29 = vshrl.u32 %v51_v28, 7 }
   0x4   :  { %115 = vmatprep.subr.bf16.mxu0 %v440_v3  ;;  %431 = vmatprep.subr.bf16.mxu1 %v440_v3  ;;  %v31_v9 = vld [vmem:[%s744_s0 + $0x40] sm:$0xff]  ;;  %v32_v10 = vld [vmem:[%s744_s0 + $0x48] sm:$0xff]  ;;  %v36_v11 = vpack.c.bf16 %v24_v8, %v23_v7  ;;  %v26_v14 = vld [vmem:[%s744_s0 + $0x18] sm:$0xff] }
   0x5   :  { %v40_v12 = vpack.c.bf16 %v32_v10, %v31_v9  ;;  %v33_v15 = vld [vmem:[%s744_s0 + $0x50] sm:$0xff]  ;;  %v34_v16 = vld [vmem:[%s744_s0 + $0x58] sm:$0xff]  ;;  %v37_v17 = vpack.c.bf16 %v26_v14, %v25_v13  ;;  %v27_v19 = vld [vmem:[%s744_s0 + $0x20] sm:$0xff]  ;;  %v53_v30 = vsub.s32 0, %v52_v29  ;;  %v57_v32 = vsub.s32 1, %v52_v29 }
   0x6   :  { %v41_v18 = vpack.c.bf16 %v34_v16, %v33_v15  ;;  %v28_v20 = vld [vmem:[%s744_s0 + $0x28] sm:$0xff]  ;;  %v35_v21 = vld [vmem:[%s744_s0 + $0x60] sm:$0xff]  ;;  %v29_v24 = vld [vmem:[%s744_s0 + $0x30] sm:$0xff] }
   0x7   :  { %116 = vmatpush1.bf16.msra.mxu0 %v442_v4  ;;  %434 = vmatpush1.bf16.msra.mxu1 %v442_v4  ;;  %v38_v22 = vpack.c.bf16 %v28_v20, %v27_v19  ;;  %v42_v23 = vpack.c.bf16 %v35_v21, %v35_v21  ;;  %v30_v25 = vld [vmem:[%s744_s0 + $0x38] sm:$0xff]  ;;  %v49_v31 = vld [vmem:[%s746_s2] sm:$0x3] }
   0x8   :  { %117 = vmatprep.subr.bf16.mxu0 %v443_v5  ;;  %432 = vmatprep.subr.bf16.mxu1 %v443_v5  ;;  %v39_v26 = vpack.c.bf16 %v30_v25, %v29_v24  ;;  %v625_v33 = vrot.slane %v49_v31, %v53_v30  ;;  %v627_v34 = vrot.slane %v49_v31, %v57_v32 }
   0xb   :  { %118 = vmatpush1.bf16.msra.mxu0 %v445_v6  ;;  %435 = vmatpush1.bf16.msra.mxu1 %v445_v6 }
   0xe   :  { %408 = vmatmul.mubr.msk.bf16.vlgmr.msra.gmra.mrb[0].mxu0 %vm91_vm0, %v36_v11  ;;  %412 = vmatmul.mubr.msk.bf16.vlgmr.msra.gmra.mrb[0].mxu1 %vm91_vm0, %v40_v12 }
   0xf   :  { %155 = vmatprep.mubr.bf16.mxu0 %v524_v1  ;;  %195 = vmatprep.mubr.bf16.mxu1 %v524_v1 }
  0x16   :  { %409 = vmatmul.mubr.msk.bf16.gmra.mrb[4].mxu0 %vm91_vm0, %v37_v17  ;;  %413 = vmatmul.mubr.msk.bf16.gmra.mrb[4].mxu1 %vm91_vm0, %v41_v18 }
  0x17   :  { %165 = vmatprep.mubr.bf16.mxu0 %v524_v1  ;;  %205 = vmatprep.mubr.bf16.mxu1 %v524_v1 }
  0x1e   :  { %410 = vmatmul.mubr.msk.bf16.gmra.mrb[8].mxu0 %vm91_vm0, %v38_v22  ;;  %414 = vmatmul.mubr.msk.bf16.gmra.mrb[8].mxu1 %vm91_vm0, %v42_v23 }
  0x1f   :  { %175 = vmatprep.mubr.bf16.mxu0 %v524_v1 }
  0x26   :  { %411 = vmatmul.mubr.msk.bf16.gmra.mrb[12].mxu0 %vm91_vm0, %v39_v26 }
  0xe1   :  { %v147_v35 = vpop.f32.mrb[0].mxu0  ;;  %v187_v36 = vpop.f32.mrb[0].mxu1 }
  0xe2   :  { %v148_v37 = vadd.f32 %v147_v35, %v625_v33  ;;  %v149_v38 = vpop.f32.mrb[1].mxu0  ;;  %v189_v39 = vpop.f32.mrb[1].mxu1  ;;  %v188_v46 = vadd.f32 %v187_v36, %v625_v33 }
  0xe3   :  { %v150_v40 = vadd.f32 %v149_v38, %v627_v34  ;;  %v190_v41 = vadd.f32 %v189_v39, %v627_v34  ;;  %v151_v42 = vpop.f32.mrb[2].mxu0  ;;  %v191_v43 = vpop.f32.mrb[2].mxu1 }
  0xe4   :  { %v153_v44 = vpop.f32.mrb[3].mxu0  ;;  %v193_v45 = vpop.f32.mrb[3].mxu1  ;;  %446 = vtanh.f32 %v148_v37  ;;  %v152_v52 = vadd.f32 %v151_v42, %v625_v33  ;;  %v192_v56 = vadd.f32 %v191_v43, %v625_v33 }
  0xe5   :  { %v415_v47 = vmul.f32 -1.442695, %v150_v40  ;;  %v423_v48 = vmul.f32 -1.442695, %v190_v41  ;;  %v154_v49 = vadd.f32 %v153_v44, %v627_v34  ;;  %v194_v50 = vadd.f32 %v193_v45, %v627_v34 }
  0xe7   :  { %448 = vpow2.f32 %v415_v47  ;;  %v416_v51 = vmul.f32 -1.442695, %v154_v49  ;;  %v424_v53 = vmul.f32 -1.442695, %v194_v50 }
  0xe8   :  { %450 = vpow2.f32 %v423_v48 }
  0xe9   :  { %452 = vtanh.f32 %v188_v46  ;;  %v157_v54 = vpop.f32.mrb[4].mxu0  ;;  %v197_v55 = vpop.f32.mrb[4].mxu1 }
  0xea   :  { %454 = vpow2.f32 %v416_v51  ;;  %v159_v57 = vpop.f32.mrb[5].mxu0  ;;  %v199_v58 = vpop.f32.mrb[5].mxu1  ;;  %v158_v1 = vadd.f32 %v157_v54, %v625_v33  ;;  %v198_v14 = vadd.f32 %v197_v55, %v625_v33  ;;  %v665_v55 = vld [vmem:[%s747_s3] ss:$0 sm:$0xff] }
  0xeb   :  { %456 = vpow2.f32 %v424_v53  ;;  %v160_v59 = vadd.f32 %v159_v57, %v627_v34  ;;  %v200_v60 = vadd.f32 %v199_v58, %v627_v34  ;;  %v161_v61 = vpop.f32.mrb[6].mxu0  ;;  %v201_v62 = vpop.f32.mrb[6].mxu1 }
  0xec   :  { %458 = vtanh.f32 %v152_v52  ;;  %v163_v63 = vpop.f32.mrb[7].mxu0  ;;  %v203_v0 = vpop.f32.mrb[7].mxu1  ;;  %v162_v28 = vadd.f32 %v161_v61, %v625_v33  ;;  %v202_v41 = vadd.f32 %v201_v62, %v625_v33 }
  0xed   :  { %v417_v2 = vmul.f32 -1.442695, %v160_v59  ;;  %v425_v3 = vmul.f32 -1.442695, %v200_v60  ;;  %v164_v4 = vadd.f32 %v163_v63, %v627_v34  ;;  %460 = vtanh.f32 %v192_v56 }
  0xee   :  { %v204_v5 = vadd.f32 %v203_v0, %v627_v34  ;;  %v642_v7 = vpop.eup %446 }
  0xef   :  { %462 = vpow2.f32 %v417_v2  ;;  %v418_v6 = vmul.f32 -1.442695, %v164_v4 }
  0xf0   :  { %464 = vpow2.f32 %v425_v3  ;;  %v426_v8 = vmul.f32 -1.442695, %v204_v5 }
  0xf1   :  { %v449_v9 = vpop.eup %448  ;;  %466 = vtanh.f32 %v158_v1  ;;  %v644_v10 = vpop.f32.mrb[8].mxu0 }
  0xf2   :  { %v646_v11 = vpop.f32.mrb[8].mxu1  ;;  %v451_v12 = vpop.eup %450  ;;  %v266_v13 = vadd.f32 1.0, %v449_v9  ;;  %468 = vpow2.f32 %v418_v6  ;;  %v168_v60 = vadd.f32 %v644_v10, %v625_v33 }
  0xf3   :  { %v169_v15 = vpop.f32.mrb[9].mxu0  ;;  %v209_v16 = vpop.f32.mrb[9].mxu1  ;;  %v274_v18 = vadd.f32 1.0, %v451_v12  ;;  %470 = vpow2.f32 %v426_v8  ;;  %v208_v1 = vadd.f32 %v646_v11, %v625_v33 }
  0xf4   :  { %v453_v17 = vpop.eup %452  ;;  %v170_v19 = vadd.f32 %v169_v15, %v627_v34  ;;  %v210_v20 = vadd.f32 %v209_v16, %v627_v34  ;;  %v651_v21 = vpop.f32.mrb[10].mxu0  ;;  %472 = vrcp.f32 %v266_v13 }
  0xf5   :  { %v211_v22 = vpop.f32.mrb[10].mxu1  ;;  %v455_v23 = vpop.eup %454  ;;  %474 = vrcp.f32 %v274_v18 }
  0xf6   :  { %v173_v24 = vpop.f32.mrb[11].mxu0  ;;  %v212_v25 = vpop.f32.mrb[11].mxu1  ;;  %v267_v27 = vadd.f32 1.0, %v455_v23  ;;  %476 = vtanh.f32 %v198_v14  ;;  %v419_v31 = vmul.f32 -1.442695, %v170_v19 }
  0xf7   :  { %v457_v26 = vpop.eup %456  ;;  %v427_v32 = vmul.f32 -1.442695, %v210_v20  ;;  %v174_v37 = vadd.f32 %v173_v24, %v627_v34 }
  0xf8   :  { %v459_v29 = vpop.eup %458  ;;  %v275_v30 = vadd.f32 1.0, %v457_v26  ;;  %478 = vrcp.f32 %v267_v27 }
  0xf9   :  { %v461_v35 = vpop.eup %460  ;;  %v655_v38 = vpop.f32.mrb[12].mxu0  ;;  %v420_v51 = vmul.f32 -1.442695, %v174_v37 }
  0xfa   :  { %480 = vrcp.f32 %v275_v30  ;;  %v463_v36 = vpop.eup %462  ;;  %v179_v42 = vpop.f32.mrb[13].mxu0  ;;  %v178_v24 = vadd.f32 %v655_v38, %v625_v33 }
  0xfb   :  { %482 = vtanh.f32 %v162_v28  ;;  %v465_v39 = vpop.eup %464  ;;  %v268_v40 = vadd.f32 1.0, %v463_v36  ;;  %v180_v45 = vadd.f32 %v179_v42, %v627_v34  ;;  %v659_v46 = vpop.f32.mrb[14].mxu0 }
  0xfc   :  { %484 = vpow2.f32 %v419_v31  ;;  %v467_v43 = vpop.eup %466  ;;  %v276_v44 = vadd.f32 1.0, %v465_v39  ;;  %v183_v48 = vpop.f32.mrb[15].mxu0  ;;  %v182_v28 = vadd.f32 %v659_v46, %v625_v33 }
  0xfd   :  { %486 = vpow2.f32 %v427_v32  ;;  %v469_v47 = vpop.eup %468  ;;  %v184_v52 = vadd.f32 %v183_v48, %v627_v34  ;;  %v421_v57 = vmul.f32 -1.442695, %v180_v45 }
  0xfe   :  { %488 = vrcp.f32 %v268_v40  ;;  %v471_v49 = vpop.eup %470  ;;  %v269_v50 = vadd.f32 1.0, %v469_v47 }
  0xff   :  { %490 = vrcp.f32 %v276_v44  ;;  %v473_v53 = vpop.eup %472  ;;  %v277_v54 = vadd.f32 1.0, %v471_v49  ;;  %v422_v62 = vmul.f32 -1.442695, %v184_v52 }
 0x100   :  { %492 = vtanh.f32 %v202_v41  ;;  %v475_v56 = vpop.eup %474  ;;  %v305_v58 = vmul.f32 %v473_v53, %v642_v7 }
 0x101   :  { %494 = vrcp.f32 %v269_v50  ;;  %v477_v59 = vpop.eup %476  ;;  %v313_v61 = vmul.f32 %v475_v56, %v453_v17  ;;  %v172_v17 = vadd.f32 %v651_v21, %v625_v33  ;;  %v429_v56 = vld [vmem:[#allocation2] ss:$0 sm:$0xff] }
 0x102   :  { %496 = vrcp.f32 %v277_v54  ;;  %v479_v34 = vpop.eup %478  ;;  %v325_v63 = vmul.f32 %v665_v55, %v305_v58 }
 0x103   :  { %498 = vpow2.f32 %v420_v51  ;;  %v306_v2 = vmul.f32 %v479_v34, %v459_v29  ;;  %v333_v9 = vmul.f32 %v665_v55, %v313_v61 }
 0x104   :  { %v481_v0 = vpop.eup %480  ;;  %500 = vpow2.f32 %v421_v57  ;;  %338 = vadd.xlane.f32.xlu0 %v325_v63 }
 0x105   :  { %v483_v3 = vpop.eup %482  ;;  %v314_v4 = vmul.f32 %v481_v0, %v461_v35  ;;  %502 = vtanh.f32 %v168_v60  ;;  %v326_v19 = vmul.f32 %v665_v55, %v306_v2 }
 0x106   :  { %v485_v5 = vpop.eup %484  ;;  %504 = vpow2.f32 %v422_v62 }
 0x107   :  { %v487_v6 = vpop.eup %486  ;;  %v270_v7 = vadd.f32 1.0, %v485_v5  ;;  %v334_v8 = vmul.f32 %v665_v55, %v314_v4  ;;  %506 = vtanh.f32 %v208_v1 }
 0x108   :  { %v489_v10 = vpop.eup %488  ;;  %v278_v12 = vadd.f32 1.0, %v487_v6  ;;  %354 = vadd.xlane.f32.xlu0 %v333_v9 }
 0x109   :  { %v491_v13 = vpop.eup %490  ;;  %508 = vrcp.f32 %v270_v7  ;;  %356 = vadd.xlane.f32.xlu1 %v334_v8  ;;  %v307_v11 = vmul.f32 %v489_v10, %v467_v43 }
 0x10a   :  { %v493_v14 = vpop.eup %492  ;;  %510 = vrcp.f32 %v278_v12  ;;  %v315_v15 = vmul.f32 %v491_v13, %v477_v59 }
 0x10b   :  { %v495_v16 = vpop.eup %494  ;;  %v327_v18 = vmul.f32 %v665_v55, %v307_v11  ;;  %512 = vtanh.f32 %v172_v17 }
 0x10c   :  { %v497_v20 = vpop.eup %496  ;;  %v308_v22 = vmul.f32 %v495_v16, %v483_v3  ;;  %340 = vadd.xlane.f32.xlu0 %v326_v19  ;;  %v335_v29 = vmul.f32 %v665_v55, %v315_v15 }
 0x10d   :  { %v499_v23 = vpop.eup %498  ;;  %342 = vadd.xlane.f32.xlu1 %v327_v18  ;;  %v316_v25 = vmul.f32 %v497_v20, %v493_v14 }
 0x10e   :  { %v271_v26 = vadd.f32 1.0, %v499_v23  ;;  %v501_v27 = vpop.eup %500  ;;  %v328_v21 = vmul.f32 %v665_v55, %v308_v22 }
 0x10f   :  { %v503_v30 = vpop.eup %502  ;;  %v272_v31 = vadd.f32 1.0, %v501_v27  ;;  %v336_v54 = vmul.f32 %v665_v55, %v316_v25 }
 0x110   :  { %514 = vrcp.f32 %v271_v26  ;;  %v505_v32 = vpop.eup %504  ;;  %358 = vadd.xlane.f32.xlu0 %v335_v29 }
 0x111   :  { %516 = vtanh.f32 %v178_v24  ;;  %344 = vadd.xlane.f32.xlu1 %v328_v21  ;;  %v507_v35 = vpop.eup %506  ;;  %v273_v36 = vadd.f32 1.0, %v505_v32 }
 0x112   :  { %518 = vrcp.f32 %v272_v31 }
 0x113   :  { %v509_v37 = vpop.eup %508  ;;  %520 = vtanh.f32 %v182_v28 }
 0x114   :  { %v511_v38 = vpop.eup %510  ;;  %522 = vrcp.f32 %v273_v36  ;;  %v309_v39 = vmul.f32 %v509_v37, %v503_v30 }
 0x115   :  { %v317_v33 = vmul.f32 %v511_v38, %v507_v35  ;;  %v513_v41 = vpop.eup %512 }
 0x116   :  { %v329_v40 = vmul.f32 %v665_v55, %v309_v39 }
 0x117   :  { %v337_v53 = vmul.f32 %v665_v55, %v317_v33 }
 0x118   :  { %346 = vadd.xlane.f32.xlu0 %v329_v40 }
 0x11a   :  { %v515_v42 = vpop.eup %514 }
 0x11b   :  { %v517_v43 = vpop.eup %516  ;;  %v310_v44 = vmul.f32 %v515_v42, %v513_v41 }
 0x11c   :  { %v519_v45 = vpop.eup %518 }
 0x11d   :  { %v521_v46 = vpop.eup %520  ;;  %v330_v47 = vmul.f32 %v665_v55, %v310_v44  ;;  %v311_v48 = vmul.f32 %v519_v45, %v517_v43 }
 0x11e   :  { %v523_v49 = vpop.eup %522 }
 0x11f   :  { %348 = vadd.xlane.f32.xlu1 %v330_v47  ;;  %v331_v50 = vmul.f32 %v665_v55, %v311_v48  ;;  %v312_v51 = vmul.f32 %v523_v49, %v521_v46 }
 0x121   :  { %350 = vadd.xlane.f32.xlu0 %v331_v50  ;;  %v332_v52 = vmul.f32 %v665_v55, %v312_v51 }
 0x123   :  { %352 = vadd.xlane.f32.xlu1 %v332_v52 }
 0x125   :  { %362 = vadd.xlane.f32.xlu0 %v337_v53 }
 0x127   :  { %360 = vadd.xlane.f32.xlu1 %v336_v54 }
 0x191   :  { %v339_v57 = vpop.xlane.xlu0 %338 }
 0x192   :  { %v371_v58 = vadd.f32 %v429_v56, %v339_v57 }
 0x194   :  { %385 = vst.msk [vmem:[%s748_s5] sm:$0xff] %vm384_vm1, %v371_v58 }
 0x195   :  { %v355_v60 = vpop.xlane.xlu0 %354 }
 0x196   :  { %v357_v59 = vpop.xlane.xlu1 %356  ;;  %v379_v34 = vadd.f32 %v429_v56, %v355_v60 }
 0x197   :  { %v380_v61 = vadd.f32 %v429_v56, %v357_v59 }
 0x198   :  { %393 = vst.msk [vmem:[%s748_s5 + $0x40] sm:$0xff] %vm384_vm1, %v379_v34 }
 0x199   :  { %394 = vst.msk [vmem:[%s748_s5 + $0x48] sm:$0xff] %vm384_vm1, %v380_v61  ;;  %v341_v62 = vpop.xlane.xlu0 %340 }
 0x19a   :  { %v343_v55 = vpop.xlane.xlu1 %342  ;;  %v372_v0 = vadd.f32 %v429_v56, %v341_v62 }
 0x19b   :  { %v373_v63 = vadd.f32 %v429_v56, %v343_v55 }
 0x19c   :  { %386 = vst.msk [vmem:[%s748_s5 + $0x8] sm:$0xff] %vm384_vm1, %v372_v0 }
 0x19d   :  { %387 = vst.msk [vmem:[%s748_s5 + $0x10] sm:$0xff] %vm384_vm1, %v373_v63  ;;  %v359_v2 = vpop.xlane.xlu0 %358 }
 0x19e   :  { %v345_v1 = vpop.xlane.xlu1 %344  ;;  %v381_v4 = vadd.f32 %v429_v56, %v359_v2 }
 0x19f   :  { %v374_v3 = vadd.f32 %v429_v56, %v345_v1 }
 0x1a0   :  { %395 = vst.msk [vmem:[%s748_s5 + $0x50] sm:$0xff] %vm384_vm1, %v381_v4 }
 0x1a1   :  { %388 = vst.msk [vmem:[%s748_s5 + $0x18] sm:$0xff] %vm384_vm1, %v374_v3 }
 0x1a5   :  { %v347_v5 = vpop.xlane.xlu0 %346 }
 0x1a6   :  { %v375_v6 = vadd.f32 %v429_v56, %v347_v5 }
 0x1a8   :  { %389 = vst.msk [vmem:[%s748_s5 + $0x20] sm:$0xff] %vm384_vm1, %v375_v6 }
 0x1ac   :  { %v349_v7 = vpop.xlane.xlu1 %348 }
 0x1ad   :  { %v376_v8 = vadd.f32 %v429_v56, %v349_v7 }
 0x1ae   :  { %v351_v9 = vpop.xlane.xlu0 %350 }
 0x1af   :  { %390 = vst.msk [vmem:[%s748_s5 + $0x28] sm:$0xff] %vm384_vm1, %v376_v8  ;;  %v377_v10 = vadd.f32 %v429_v56, %v351_v9 }
 0x1b0   :  { %v353_v12 = vpop.xlane.xlu1 %352 }
 0x1b1   :  { %391 = vst.msk [vmem:[%s748_s5 + $0x30] sm:$0xff] %vm384_vm1, %v377_v10  ;;  %v378_v13 = vadd.f32 %v429_v56, %v353_v12 }
 0x1b2   :  { %v363_v11 = vpop.xlane.xlu0 %362 }
 0x1b3   :  { %392 = vst.msk [vmem:[%s748_s5 + $0x38] sm:$0xff] %vm384_vm1, %v378_v13  ;;  %v383_v14 = vadd.f32 %v429_v56, %v363_v11 }
 0x1b4   :  { %v361_v15 = vpop.xlane.xlu1 %360 }
 0x1b5   :  { %397 = vst.msk [vmem:[%s748_s5 + $0x60] sm:$0xff] %vm384_vm1, %v383_v14  ;;  %v382_v16 = vadd.f32 %v429_v56, %v361_v15 }
 0x1b7   :  { %396 = vst.msk [vmem:[%s748_s5 + $0x58] sm:$0xff] %vm384_vm1, %v382_v16 }

</bundles_post_ra>
